<compile_context>
chip_gen: v7x
topology: tpu7x:2x2x1
jax: 0.10.0
libtpu: 0.0.40
codegen_flags: <defaults>
</compile_context>

<pallas_src>
import jax
import jax.numpy as jnp
import numpy as np
from jax.experimental import pallas as pl
from jax.experimental.pallas import tpu as pltpu

_KSIZE = 31
_STRIDE = 2
_PAD = 15
_HALO = 8        # zero halo (in even/odd-lane units) so shifted conv reads stay in range


def _round_up(n, m):
    return ((n + m - 1) // m) * m


# ---------------------------------------------------------------------------
# Pallas kernel: conv (shifted VPU MACs) + relu + linear + relu + linear
# (eval-mode BatchNorm is folded into the second linear on the host).
# ---------------------------------------------------------------------------
def reduced_conv_kernel(cs_ref, xe_ref, xo_ref, w1_ref, b1_ref, w2_ref, b2_ref,
                        out_ref):
    tb = out_ref.shape[0]
    L = w1_ref.shape[0]                        # E // 2

    # Even / odd input lanes of x, zero-padded by _HALO on both sides: [tb, L+16].
    xe = xe_ref[...].astype(jnp.float32)
    xo = xo_ref[...].astype(jnp.float32)

    # Conv1d(1, 1, 31, stride=2, padding=15):
    #   out[j] = b + sum_k w[k] * x[2j + k - 15]
    # Split by tap parity (even taps hit odd input lanes, odd taps hit even):
    #   out[j] = b + sum_{m=0}^{15} w[2m]   * x_odd [j + m - 8]
    #              + sum_{m=0}^{14} w[2m+1] * x_even[j + m - 7]
    # With the 8-element zero halo, x_*[p] lives at index p + 8, so every term
    # is a static length-L lane slice -> 31 VPU multiply-accumulates.
    acc = jnp.full((tb, L), cs_ref[_KSIZE], jnp.float32)      # conv bias folded in
    for m in range(16):                                       # even taps
        acc = acc + cs_ref[2 * m] * xo[:, m:m + L]
    for m in range(15):                                       # odd taps
        acc = acc + cs_ref[2 * m + 1] * xe[:, m + 1:m + 1 + L]
    h = jnp.maximum(acc, 0.0).astype(jnp.bfloat16)            # ReLU after conv

    # Linear(L -> Hp) + bias; Dropout is identity in eval; ReLU.  (MXU, f32 acc)
    h = jnp.dot(h, w1_ref[...], preferred_element_type=jnp.float32) + b1_ref[...]
    h = jnp.maximum(h, 0.0).astype(jnp.bfloat16)

    # Output Linear(Hp -> Op).  Eval-mode BatchNorm1d already folded into w2/b2.
    out = jnp.dot(h, w2_ref[...], preferred_element_type=jnp.float32) + b2_ref[...]
    out_ref[...] = out.astype(out_ref.dtype)


def reduced_conv_forward(x, mask, params, *, tile_b=None):
    """x: [B, E] float32. mask is unused (matches the PyTorch forward signature)."""
    del mask  # unused in the reference module's forward
    cs = params["conv_scalars"]          # f32[32]  (31 taps + conv bias) -> SMEM
    w1t = params["w1t"]                  # bf16[L, Hp]
    b1 = params["b1"]                    # f32 [1, Hp]
    w2t = params["w2t"]                  # bf16[Hp, Op]  (BN folded)
    b2 = params["b2"]                    # f32 [1, Op]   (BN folded)
    out_dim = params["out_dim"]

    B, E = x.shape
    assert E % 2 == 0, "ReducedConv stride-2 conv assumes an even embeddings_dim"
    L = E // 2
    Lp = L + 2 * _HALO
    Hp = w1t.shape[1]
    Op = w2t.shape[1]
    assert w1t.shape[0] == L

    if tile_b is None:
        # Multiple of 16 (bf16 sublane packing); 128 rows once the batch can
        # feed the MXU.  The grid is forced to >=2 steps so the BlockSpec
        # pipeline overlaps x/out DMA with compute and v7x can shard the batch
        # axis across its two TensorCores.
        tile_b = 128 if B >= 256 else 16
    assert tile_b % 16 == 0
    n_tiles = max(2, -(-B // tile_b))
    Bp = n_tiles * tile_b

    # Layout plumbing (host side): bf16 cast, zero-pad the batch, even/odd split
    # of the conv input, and an 8-lane zero halo so in-kernel shifts never read
    # out of range.
    xb = jnp.zeros((Bp, E), jnp.bfloat16).at[:B].set(x.astype(jnp.bfloat16))
    x_eo = xb.reshape(Bp, L, 2)
    halo = jnp.zeros((Bp, _HALO), jnp.bfloat16)
    xe = jnp.concatenate([halo, x_eo[:, :, 0], halo], axis=1)     # [Bp, L+16]
    xo = jnp.concatenate([halo, x_eo[:, :, 1], halo], axis=1)     # [Bp, L+16]

    const = lambda shape: pl.BlockSpec(shape, lambda i: (0, 0))

    out_p = pl.pallas_call(
        reduced_conv_kernel,
        out_shape=jax.ShapeDtypeStruct((Bp, Op), jnp.float32),
        grid_spec=pltpu.PrefetchScalarGridSpec(
            num_scalar_prefetch=0,
            grid=(n_tiles,),
            in_specs=[
                pl.BlockSpec(memory_space=pltpu.MemorySpace.SMEM),  # taps + conv bias
                pl.BlockSpec((tile_b, Lp), lambda i: (i, 0)),       # x even lanes
                pl.BlockSpec((tile_b, Lp), lambda i: (i, 0)),       # x odd lanes
                const((L, Hp)),                                     # W1^T (bf16)
                const((1, Hp)),                                     # b1
                const((Hp, Op)),                                    # W2^T, BN folded
                const((1, Op)),                                     # b2,  BN folded
            ],
            out_specs=pl.BlockSpec((tile_b, Op), lambda i: (i, 0)),
        ),
        compiler_params=pltpu.CompilerParams(
            dimension_semantics=("parallel",)),
    )(cs, xe, xo, w1t, b1, w2t, b2)

    return out_p[:B, :out_dim]


# ---------------------------------------------------------------------------
# Parameter construction (deterministic) and glue
# ---------------------------------------------------------------------------
def make_params(key, embeddings_dim, hidden_dim, output_dim, kernel_size=31,
                stride=2, padding=15, bn_eps=1e-5):
    assert (kernel_size, stride, padding) == (_KSIZE, _STRIDE, _PAD), (
        "even/odd tap split in the kernel assumes Conv1d(1,1,31,stride=2,padding=15)")
    E = embeddings_dim
    assert E % 2 == 0
    L = E // 2
    H, O = hidden_dim, output_dim

    ks = jax.random.split(key, 8)
    wconv = jax.random.normal(ks[0], (kernel_size,), jnp.float32) * 0.2
    bconv = jax.random.normal(ks[1], (), jnp.float32) * 0.1
    w1 = jax.random.normal(ks[2], (H, L), jnp.float32) * 0.1       # torch layout [out,in]
    b1 = jax.random.normal(ks[3], (H,), jnp.float32) * 0.1
    gamma = 1.0 + 0.1 * jax.random.normal(ks[4], (H,), jnp.float32)
    beta = 0.1 * jax.random.normal(ks[5], (H,), jnp.float32)
    running_mean = jnp.zeros((H,), jnp.float32)
    running_var = jnp.ones((H,), jnp.float32)
    w2 = jax.random.normal(ks[6], (O, H), jnp.float32) * 0.1
    b2 = jax.random.normal(ks[7], (O,), jnp.float32) * 0.1

    raw = dict(wconv=wconv, bconv=bconv, w1=w1, b1=b1, gamma=gamma, beta=beta,
               running_mean=running_mean, running_var=running_var, w2=w2, b2=b2,
               stride=stride, padding=padding, bn_eps=bn_eps)

    # --- glue: fold eval-mode BatchNorm into the output linear (exact) -------
    bn_scale = gamma / jnp.sqrt(running_var + bn_eps)           # [H]
    bn_shift = beta - running_mean * bn_scale                   # [H]
    w2t_bn = bn_scale[:, None] * jnp.transpose(w2)              # [H, O]
    b2_bn = b2 + bn_shift @ jnp.transpose(w2)                   # [O]

    # --- glue: pad hidden/output dims to 128 lanes (lane-dense MXU + stores) -
    Hp = _round_up(H, 128)
    Op = _round_up(O, 128)
    w1t = jnp.zeros((L, Hp), jnp.float32).at[:, :H].set(jnp.transpose(w1))
    b1p = jnp.zeros((Hp,), jnp.float32).at[:H].set(b1)
    w2tp = jnp.zeros((Hp, Op), jnp.float32).at[:H, :O].set(w2t_bn)
    b2p = jnp.zeros((Op,), jnp.float32).at[:O].set(b2_bn)

    kernel_params = dict(
        conv_scalars=jnp.concatenate([wconv, bconv[None]]).astype(jnp.float32),
        w1t=w1t.astype(jnp.bfloat16),
        b1=b1p.reshape(1, Hp).astype(jnp.float32),
        w2t=w2tp.astype(jnp.bfloat16),
        b2=b2p.reshape(1, Op).astype(jnp.float32),
        out_dim=O,
    )
    return raw, kernel_params


def ref_forward(x, raw):
    """Pure-JAX reference mirroring the PyTorch module (eval mode)."""
    w = raw["wconv"].reshape(1, 1, -1)
    o = jax.lax.conv_general_dilated(
        x[:, None, :], w, window_strides=(raw["stride"],),
        padding=[(raw["padding"], raw["padding"])],
        dimension_numbers=("NCH", "OIH", "NCH")) + raw["bconv"]
    o = jax.nn.relu(o).reshape(x.shape[0], -1)
    o = o @ raw["w1"].T + raw["b1"]
    o = jax.nn.relu(o)                                  # dropout is identity in eval
    o = (o - raw["running_mean"]) / jnp.sqrt(raw["running_var"] + raw["bn_eps"])
    o = o * raw["gamma"] + raw["beta"]
    return o @ raw["w2"].T + raw["b2"]


if __name__ == "__main__":
    # Small shapes consistent with the module (embeddings_dim scaled down 1024 -> 128).
    B, E, H, O = 8, 128, 32, 12

    key = jax.random.PRNGKey(0)
    kx, kp = jax.random.split(key)
    x = jax.random.normal(kx, (B, E), jnp.float32)
    mask = jnp.ones((B,), jnp.float32)                  # unused by the forward pass

    raw, kernel_params = make_params(kp, E, H, O)

    out = reduced_conv_forward(x, mask, kernel_params)
    out = jax.block_until_ready(out)

    ref = ref_forward(x, raw)
    np.testing.assert_allclose(np.asarray(out), np.asarray(ref), rtol=2e-2, atol=2e-2)
    assert out.shape == (B, O)

    print("KERNEL_OK")
</pallas_src>

<mosaic_0001>
module attributes {stable_mosaic.version = 11 : i64} {
  func.func @reduced_conv_kernel(%arg0: i32, %arg1: memref<32xf32, #tpu.memory_space<smem>>, %arg2: memref<16x80xbf16, #tpu.memory_space<vmem>>, %arg3: memref<16x80xbf16, #tpu.memory_space<vmem>>, %arg4: memref<64x128xbf16, #tpu.memory_space<vmem>>, %arg5: memref<1x128xf32, #tpu.memory_space<vmem>>, %arg6: memref<128x128xbf16, #tpu.memory_space<vmem>>, %arg7: memref<1x128xf32, #tpu.memory_space<vmem>>, %arg8: memref<16x128xf32, #tpu.memory_space<vmem>>) attributes {dimension_semantics = [#tpu.dimension_semantics<parallel>], iteration_bounds = array<i64: 2>, scalar_prefetch = 0 : i64, scratch_operands = 0 : i64, tpu.core_type = #tpu.core_type<tc>, window_params = [{transform_indices = @transform_0, window_bounds = array<i64: 32>}, {transform_indices = @transform_1, window_bounds = array<i64: 16, 80>}, {transform_indices = @transform_2, window_bounds = array<i64: 16, 80>}, {pipeline_mode = #tpu.pipeline_mode<synchronous>, transform_indices = @transform_3, window_bounds = array<i64: 64, 128>}, {pipeline_mode = #tpu.pipeline_mode<synchronous>, transform_indices = @transform_4, window_bounds = array<i64: 1, 128>}, {pipeline_mode = #tpu.pipeline_mode<synchronous>, transform_indices = @transform_5, window_bounds = array<i64: 128, 128>}, {pipeline_mode = #tpu.pipeline_mode<synchronous>, transform_indices = @transform_6, window_bounds = array<i64: 1, 128>}, {transform_indices = @transform_7, window_bounds = array<i64: 16, 128>}]} {
    %c0 = arith.constant 0 : index
    %c0_0 = arith.constant 0 : index
    %0 = vector.load %arg2[%c0, %c0_0] : memref<16x80xbf16, #tpu.memory_space<vmem>>, vector<16x80xbf16>
    %1 = arith.extf %0 : vector<16x80xbf16> to vector<16x80xf32>
    %c0_1 = arith.constant 0 : index
    %c0_2 = arith.constant 0 : index
    %2 = vector.load %arg3[%c0_1, %c0_2] : memref<16x80xbf16, #tpu.memory_space<vmem>>, vector<16x80xbf16>
    %3 = arith.extf %2 : vector<16x80xbf16> to vector<16x80xf32>
    %c31 = arith.constant 31 : index
    %4 = memref.load %arg1[%c31] : memref<32xf32, #tpu.memory_space<smem>>
    %5 = vector.broadcast %4 : f32 to vector<16x64xf32>
    %c0_3 = arith.constant 0 : index
    %6 = memref.load %arg1[%c0_3] : memref<32xf32, #tpu.memory_space<smem>>
    %7 = vector.extract_strided_slice %3 {offsets = [0, 0], sizes = [16, 64], strides = [1, 1]} : vector<16x80xf32> to vector<16x64xf32>
    %8 = vector.broadcast %6 : f32 to vector<16x64xf32>
    %9 = arith.mulf %8, %7 : vector<16x64xf32>
    %10 = arith.addf %5, %9 : vector<16x64xf32>
    %c2 = arith.constant 2 : index
    %11 = memref.load %arg1[%c2] : memref<32xf32, #tpu.memory_space<smem>>
    %12 = vector.extract_strided_slice %3 {offsets = [0, 1], sizes = [16, 64], strides = [1, 1]} : vector<16x80xf32> to vector<16x64xf32>
    %13 = vector.broadcast %11 : f32 to vector<16x64xf32>
    %14 = arith.mulf %13, %12 : vector<16x64xf32>
    %15 = arith.addf %10, %14 : vector<16x64xf32>
    %c4 = arith.constant 4 : index
    %16 = memref.load %arg1[%c4] : memref<32xf32, #tpu.memory_space<smem>>
    %17 = vector.extract_strided_slice %3 {offsets = [0, 2], sizes = [16, 64], strides = [1, 1]} : vector<16x80xf32> to vector<16x64xf32>
    %18 = vector.broadcast %16 : f32 to vector<16x64xf32>
    %19 = arith.mulf %18, %17 : vector<16x64xf32>
    %20 = arith.addf %15, %19 : vector<16x64xf32>
    %c6 = arith.constant 6 : index
    %21 = memref.load %arg1[%c6] : memref<32xf32, #tpu.memory_space<smem>>
    %22 = vector.extract_strided_slice %3 {offsets = [0, 3], sizes = [16, 64], strides = [1, 1]} : vector<16x80xf32> to vector<16x64xf32>
    %23 = vector.broadcast %21 : f32 to vector<16x64xf32>
    %24 = arith.mulf %23, %22 : vector<16x64xf32>
    %25 = arith.addf %20, %24 : vector<16x64xf32>
    %c8 = arith.constant 8 : index
    %26 = memref.load %arg1[%c8] : memref<32xf32, #tpu.memory_space<smem>>
    %27 = vector.extract_strided_slice %3 {offsets = [0, 4], sizes = [16, 64], strides = [1, 1]} : vector<16x80xf32> to vector<16x64xf32>
    %28 = vector.broadcast %26 : f32 to vector<16x64xf32>
    %29 = arith.mulf %28, %27 : vector<16x64xf32>
    %30 = arith.addf %25, %29 : vector<16x64xf32>
    %c10 = arith.constant 10 : index
    %31 = memref.load %arg1[%c10] : memref<32xf32, #tpu.memory_space<smem>>
    %32 = vector.extract_strided_slice %3 {offsets = [0, 5], sizes = [16, 64], strides = [1, 1]} : vector<16x80xf32> to vector<16x64xf32>
    %33 = vector.broadcast %31 : f32 to vector<16x64xf32>
    %34 = arith.mulf %33, %32 : vector<16x64xf32>
    %35 = arith.addf %30, %34 : vector<16x64xf32>
    %c12 = arith.constant 12 : index
    %36 = memref.load %arg1[%c12] : memref<32xf32, #tpu.memory_space<smem>>
    %37 = vector.extract_strided_slice %3 {offsets = [0, 6], sizes = [16, 64], strides = [1, 1]} : vector<16x80xf32> to vector<16x64xf32>
    %38 = vector.broadcast %36 : f32 to vector<16x64xf32>
    %39 = arith.mulf %38, %37 : vector<16x64xf32>
    %40 = arith.addf %35, %39 : vector<16x64xf32>
    %c14 = arith.constant 14 : index
    %41 = memref.load %arg1[%c14] : memref<32xf32, #tpu.memory_space<smem>>
    %42 = vector.extract_strided_slice %3 {offsets = [0, 7], sizes = [16, 64], strides = [1, 1]} : vector<16x80xf32> to vector<16x64xf32>
    %43 = vector.broadcast %41 : f32 to vector<16x64xf32>
    %44 = arith.mulf %43, %42 : vector<16x64xf32>
    %45 = arith.addf %40, %44 : vector<16x64xf32>
    %c16 = arith.constant 16 : index
    %46 = memref.load %arg1[%c16] : memref<32xf32, #tpu.memory_space<smem>>
    %47 = vector.extract_strided_slice %3 {offsets = [0, 8], sizes = [16, 64], strides = [1, 1]} : vector<16x80xf32> to vector<16x64xf32>
    %48 = vector.broadcast %46 : f32 to vector<16x64xf32>
    %49 = arith.mulf %48, %47 : vector<16x64xf32>
    %50 = arith.addf %45, %49 : vector<16x64xf32>
    %c18 = arith.constant 18 : index
    %51 = memref.load %arg1[%c18] : memref<32xf32, #tpu.memory_space<smem>>
    %52 = vector.extract_strided_slice %3 {offsets = [0, 9], sizes = [16, 64], strides = [1, 1]} : vector<16x80xf32> to vector<16x64xf32>
    %53 = vector.broadcast %51 : f32 to vector<16x64xf32>
    %54 = arith.mulf %53, %52 : vector<16x64xf32>
    %55 = arith.addf %50, %54 : vector<16x64xf32>
    %c20 = arith.constant 20 : index
    %56 = memref.load %arg1[%c20] : memref<32xf32, #tpu.memory_space<smem>>
    %57 = vector.extract_strided_slice %3 {offsets = [0, 10], sizes = [16, 64], strides = [1, 1]} : vector<16x80xf32> to vector<16x64xf32>
    %58 = vector.broadcast %56 : f32 to vector<16x64xf32>
    %59 = arith.mulf %58, %57 : vector<16x64xf32>
    %60 = arith.addf %55, %59 : vector<16x64xf32>
    %c22 = arith.constant 22 : index
    %61 = memref.load %arg1[%c22] : memref<32xf32, #tpu.memory_space<smem>>
    %62 = vector.extract_strided_slice %3 {offsets = [0, 11], sizes = [16, 64], strides = [1, 1]} : vector<16x80xf32> to vector<16x64xf32>
    %63 = vector.broadcast %61 : f32 to vector<16x64xf32>
    %64 = arith.mulf %63, %62 : vector<16x64xf32>
    %65 = arith.addf %60, %64 : vector<16x64xf32>
    %c24 = arith.constant 24 : index
    %66 = memref.load %arg1[%c24] : memref<32xf32, #tpu.memory_space<smem>>
    %67 = vector.extract_strided_slice %3 {offsets = [0, 12], sizes = [16, 64], strides = [1, 1]} : vector<16x80xf32> to vector<16x64xf32>
    %68 = vector.broadcast %66 : f32 to vector<16x64xf32>
    %69 = arith.mulf %68, %67 : vector<16x64xf32>
    %70 = arith.addf %65, %69 : vector<16x64xf32>
    %c26 = arith.constant 26 : index
    %71 = memref.load %arg1[%c26] : memref<32xf32, #tpu.memory_space<smem>>
    %72 = vector.extract_strided_slice %3 {offsets = [0, 13], sizes = [16, 64], strides = [1, 1]} : vector<16x80xf32> to vector<16x64xf32>
    %73 = vector.broadcast %71 : f32 to vector<16x64xf32>
    %74 = arith.mulf %73, %72 : vector<16x64xf32>
    %75 = arith.addf %70, %74 : vector<16x64xf32>
    %c28 = arith.constant 28 : index
    %76 = memref.load %arg1[%c28] : memref<32xf32, #tpu.memory_space<smem>>
    %77 = vector.extract_strided_slice %3 {offsets = [0, 14], sizes = [16, 64], strides = [1, 1]} : vector<16x80xf32> to vector<16x64xf32>
    %78 = vector.broadcast %76 : f32 to vector<16x64xf32>
    %79 = arith.mulf %78, %77 : vector<16x64xf32>
    %80 = arith.addf %75, %79 : vector<16x64xf32>
    %c30 = arith.constant 30 : index
    %81 = memref.load %arg1[%c30] : memref<32xf32, #tpu.memory_space<smem>>
    %82 = vector.extract_strided_slice %3 {offsets = [0, 15], sizes = [16, 64], strides = [1, 1]} : vector<16x80xf32> to vector<16x64xf32>
    %83 = vector.broadcast %81 : f32 to vector<16x64xf32>
    %84 = arith.mulf %83, %82 : vector<16x64xf32>
    %85 = arith.addf %80, %84 : vector<16x64xf32>
    %c1 = arith.constant 1 : index
    %86 = memref.load %arg1[%c1] : memref<32xf32, #tpu.memory_space<smem>>
    %87 = vector.extract_strided_slice %1 {offsets = [0, 1], sizes = [16, 64], strides = [1, 1]} : vector<16x80xf32> to vector<16x64xf32>
    %88 = vector.broadcast %86 : f32 to vector<16x64xf32>
    %89 = arith.mulf %88, %87 : vector<16x64xf32>
    %90 = arith.addf %85, %89 : vector<16x64xf32>
    %c3 = arith.constant 3 : index
    %91 = memref.load %arg1[%c3] : memref<32xf32, #tpu.memory_space<smem>>
    %92 = vector.extract_strided_slice %1 {offsets = [0, 2], sizes = [16, 64], strides = [1, 1]} : vector<16x80xf32> to vector<16x64xf32>
    %93 = vector.broadcast %91 : f32 to vector<16x64xf32>
    %94 = arith.mulf %93, %92 : vector<16x64xf32>
    %95 = arith.addf %90, %94 : vector<16x64xf32>
    %c5 = arith.constant 5 : index
    %96 = memref.load %arg1[%c5] : memref<32xf32, #tpu.memory_space<smem>>
    %97 = vector.extract_strided_slice %1 {offsets = [0, 3], sizes = [16, 64], strides = [1, 1]} : vector<16x80xf32> to vector<16x64xf32>
    %98 = vector.broadcast %96 : f32 to vector<16x64xf32>
    %99 = arith.mulf %98, %97 : vector<16x64xf32>
    %100 = arith.addf %95, %99 : vector<16x64xf32>
    %c7 = arith.constant 7 : index
    %101 = memref.load %arg1[%c7] : memref<32xf32, #tpu.memory_space<smem>>
    %102 = vector.extract_strided_slice %1 {offsets = [0, 4], sizes = [16, 64], strides = [1, 1]} : vector<16x80xf32> to vector<16x64xf32>
    %103 = vector.broadcast %101 : f32 to vector<16x64xf32>
    %104 = arith.mulf %103, %102 : vector<16x64xf32>
    %105 = arith.addf %100, %104 : vector<16x64xf32>
    %c9 = arith.constant 9 : index
    %106 = memref.load %arg1[%c9] : memref<32xf32, #tpu.memory_space<smem>>
    %107 = vector.extract_strided_slice %1 {offsets = [0, 5], sizes = [16, 64], strides = [1, 1]} : vector<16x80xf32> to vector<16x64xf32>
    %108 = vector.broadcast %106 : f32 to vector<16x64xf32>
    %109 = arith.mulf %108, %107 : vector<16x64xf32>
    %110 = arith.addf %105, %109 : vector<16x64xf32>
    %c11 = arith.constant 11 : index
    %111 = memref.load %arg1[%c11] : memref<32xf32, #tpu.memory_space<smem>>
    %112 = vector.extract_strided_slice %1 {offsets = [0, 6], sizes = [16, 64], strides = [1, 1]} : vector<16x80xf32> to vector<16x64xf32>
    %113 = vector.broadcast %111 : f32 to vector<16x64xf32>
    %114 = arith.mulf %113, %112 : vector<16x64xf32>
    %115 = arith.addf %110, %114 : vector<16x64xf32>
    %c13 = arith.constant 13 : index
    %116 = memref.load %arg1[%c13] : memref<32xf32, #tpu.memory_space<smem>>
    %117 = vector.extract_strided_slice %1 {offsets = [0, 7], sizes = [16, 64], strides = [1, 1]} : vector<16x80xf32> to vector<16x64xf32>
    %118 = vector.broadcast %116 : f32 to vector<16x64xf32>
    %119 = arith.mulf %118, %117 : vector<16x64xf32>
    %120 = arith.addf %115, %119 : vector<16x64xf32>
    %c15 = arith.constant 15 : index
    %121 = memref.load %arg1[%c15] : memref<32xf32, #tpu.memory_space<smem>>
    %122 = vector.extract_strided_slice %1 {offsets = [0, 8], sizes = [16, 64], strides = [1, 1]} : vector<16x80xf32> to vector<16x64xf32>
    %123 = vector.broadcast %121 : f32 to vector<16x64xf32>
    %124 = arith.mulf %123, %122 : vector<16x64xf32>
    %125 = arith.addf %120, %124 : vector<16x64xf32>
    %c17 = arith.constant 17 : index
    %126 = memref.load %arg1[%c17] : memref<32xf32, #tpu.memory_space<smem>>
    %127 = vector.extract_strided_slice %1 {offsets = [0, 9], sizes = [16, 64], strides = [1, 1]} : vector<16x80xf32> to vector<16x64xf32>
    %128 = vector.broadcast %126 : f32 to vector<16x64xf32>
    %129 = arith.mulf %128, %127 : vector<16x64xf32>
    %130 = arith.addf %125, %129 : vector<16x64xf32>
    %c19 = arith.constant 19 : index
    %131 = memref.load %arg1[%c19] : memref<32xf32, #tpu.memory_space<smem>>
    %132 = vector.extract_strided_slice %1 {offsets = [0, 10], sizes = [16, 64], strides = [1, 1]} : vector<16x80xf32> to vector<16x64xf32>
    %133 = vector.broadcast %131 : f32 to vector<16x64xf32>
    %134 = arith.mulf %133, %132 : vector<16x64xf32>
    %135 = arith.addf %130, %134 : vector<16x64xf32>
    %c21 = arith.constant 21 : index
    %136 = memref.load %arg1[%c21] : memref<32xf32, #tpu.memory_space<smem>>
    %137 = vector.extract_strided_slice %1 {offsets = [0, 11], sizes = [16, 64], strides = [1, 1]} : vector<16x80xf32> to vector<16x64xf32>
    %138 = vector.broadcast %136 : f32 to vector<16x64xf32>
    %139 = arith.mulf %138, %137 : vector<16x64xf32>
    %140 = arith.addf %135, %139 : vector<16x64xf32>
    %c23 = arith.constant 23 : index
    %141 = memref.load %arg1[%c23] : memref<32xf32, #tpu.memory_space<smem>>
    %142 = vector.extract_strided_slice %1 {offsets = [0, 12], sizes = [16, 64], strides = [1, 1]} : vector<16x80xf32> to vector<16x64xf32>
    %143 = vector.broadcast %141 : f32 to vector<16x64xf32>
    %144 = arith.mulf %143, %142 : vector<16x64xf32>
    %145 = arith.addf %140, %144 : vector<16x64xf32>
    %c25 = arith.constant 25 : index
    %146 = memref.load %arg1[%c25] : memref<32xf32, #tpu.memory_space<smem>>
    %147 = vector.extract_strided_slice %1 {offsets = [0, 13], sizes = [16, 64], strides = [1, 1]} : vector<16x80xf32> to vector<16x64xf32>
    %148 = vector.broadcast %146 : f32 to vector<16x64xf32>
    %149 = arith.mulf %148, %147 : vector<16x64xf32>
    %150 = arith.addf %145, %149 : vector<16x64xf32>
    %c27 = arith.constant 27 : index
    %151 = memref.load %arg1[%c27] : memref<32xf32, #tpu.memory_space<smem>>
    %152 = vector.extract_strided_slice %1 {offsets = [0, 14], sizes = [16, 64], strides = [1, 1]} : vector<16x80xf32> to vector<16x64xf32>
    %153 = vector.broadcast %151 : f32 to vector<16x64xf32>
    %154 = arith.mulf %153, %152 : vector<16x64xf32>
    %155 = arith.addf %150, %154 : vector<16x64xf32>
    %c29 = arith.constant 29 : index
    %156 = memref.load %arg1[%c29] : memref<32xf32, #tpu.memory_space<smem>>
    %157 = vector.extract_strided_slice %1 {offsets = [0, 15], sizes = [16, 64], strides = [1, 1]} : vector<16x80xf32> to vector<16x64xf32>
    %158 = vector.broadcast %156 : f32 to vector<16x64xf32>
    %159 = arith.mulf %158, %157 : vector<16x64xf32>
    %160 = arith.addf %155, %159 : vector<16x64xf32>
    %cst = arith.constant 0.000000e+00 : f32
    %161 = vector.broadcast %cst : f32 to vector<16x64xf32>
    %162 = arith.maximumf %160, %161 : vector<16x64xf32>
    %163 = arith.truncf %162 : vector<16x64xf32> to vector<16x64xbf16>
    %c0_4 = arith.constant 0 : index
    %c0_5 = arith.constant 0 : index
    %164 = vector.load %arg4[%c0_4, %c0_5] : memref<64x128xbf16, #tpu.memory_space<vmem>>, vector<64x128xbf16>
    %cst_6 = arith.constant dense<0.000000e+00> : vector<16x128xf32>
    %165 = tpu.matmul %163, %164, %cst_6 {dimension_numbers = #tpu.dot_dimension_numbers<[1], [0], [0], [1], [0, 0, 1, 1], [], []>} : vector<16x64xbf16>, vector<64x128xbf16>, vector<16x128xf32> -> vector<16x128xf32>
    %c0_7 = arith.constant 0 : index
    %c0_8 = arith.constant 0 : index
    %166 = vector.load %arg5[%c0_7, %c0_8] : memref<1x128xf32, #tpu.memory_space<vmem>>, vector<1x128xf32>
    %167 = vector.broadcast %166 : vector<1x128xf32> to vector<16x128xf32>
    %168 = arith.addf %165, %167 : vector<16x128xf32>
    %cst_9 = arith.constant 0.000000e+00 : f32
    %169 = vector.broadcast %cst_9 : f32 to vector<16x128xf32>
    %170 = arith.maximumf %168, %169 : vector<16x128xf32>
    %171 = arith.truncf %170 : vector<16x128xf32> to vector<16x128xbf16>
    %c0_10 = arith.constant 0 : index
    %c0_11 = arith.constant 0 : index
    %172 = vector.load %arg6[%c0_10, %c0_11] : memref<128x128xbf16, #tpu.memory_space<vmem>>, vector<128x128xbf16>
    %cst_12 = arith.constant dense<0.000000e+00> : vector<16x128xf32>
    %173 = tpu.matmul %171, %172, %cst_12 {dimension_numbers = #tpu.dot_dimension_numbers<[1], [0], [0], [1], [0, 0, 1, 1], [], []>} : vector<16x128xbf16>, vector<128x128xbf16>, vector<16x128xf32> -> vector<16x128xf32>
    %c0_13 = arith.constant 0 : index
    %c0_14 = arith.constant 0 : index
    %174 = vector.load %arg7[%c0_13, %c0_14] : memref<1x128xf32, #tpu.memory_space<vmem>>, vector<1x128xf32>
    %175 = vector.broadcast %174 : vector<1x128xf32> to vector<16x128xf32>
    %176 = arith.addf %173, %175 : vector<16x128xf32>
    %c0_15 = arith.constant 0 : index
    %c0_16 = arith.constant 0 : index
    %177 = vector.load %arg8[%c0_15, %c0_16] : memref<16x128xf32, #tpu.memory_space<vmem>>, vector<16x128xf32>
    tpu.vector_store %arg8[%c0_15, %c0_16], %176 {strides = array<i32>} : memref<16x128xf32, #tpu.memory_space<vmem>>, vector<16x128xf32>,
    return
  }
  func.func @transform_0(%arg0: i32) -> i32 {
    %c0_i32 = arith.constant 0 : i32
    %c0_i32_0 = arith.constant 0 : i32
    return %c0_i32 : i32
  }
  func.func @transform_1(%arg0: i32) -> (i32, i32) {
    %c0_i32 = arith.constant 0 : i32
    %c0_i32_0 = arith.constant 0 : i32
    return %arg0, %c0_i32 : i32, i32
  }
  func.func @transform_2(%arg0: i32) -> (i32, i32) {
    %c0_i32 = arith.constant 0 : i32
    %c0_i32_0 = arith.constant 0 : i32
    return %arg0, %c0_i32 : i32, i32
  }
  func.func @transform_3(%arg0: i32) -> (i32, i32) {
    %c0_i32 = arith.constant 0 : i32
    %c0_i32_0 = arith.constant 0 : i32
    %c0_i32_1 = arith.constant 0 : i32
    return %c0_i32, %c0_i32_0 : i32, i32
  }
  func.func @transform_4(%arg0: i32) -> (i32, i32) {
    %c0_i32 = arith.constant 0 : i32
    %c0_i32_0 = arith.constant 0 : i32
    %c0_i32_1 = arith.constant 0 : i32
    return %c0_i32, %c0_i32_0 : i32, i32
  }
  func.func @transform_5(%arg0: i32) -> (i32, i32) {
    %c0_i32 = arith.constant 0 : i32
    %c0_i32_0 = arith.constant 0 : i32
    %c0_i32_1 = arith.constant 0 : i32
    return %c0_i32, %c0_i32_0 : i32, i32
  }
  func.func @transform_6(%arg0: i32) -> (i32, i32) {
    %c0_i32 = arith.constant 0 : i32
    %c0_i32_0 = arith.constant 0 : i32
    %c0_i32_1 = arith.constant 0 : i32
    return %c0_i32, %c0_i32_0 : i32, i32
  }
  func.func @transform_7(%arg0: i32) -> (i32, i32) {
    %c0_i32 = arith.constant 0 : i32
    %c0_i32_0 = arith.constant 0 : i32
    return %arg0, %c0_i32 : i32, i32
  }
}

</mosaic_0001>

<bundles_post_ra>
// kernel: tpu_custom_call.1
= control target key start
LH: loop header
LB: loop body
LE: loop exit
PB: predicated region body
PF: predicated region fallthrough
CT: control target
= control target key end

     0   :  { %s2152_s0 = inlined_call_operand.hbm [shape: f32[32], index: 0, kind: input, shape index: {}]   ;;  %s2153_s1 = inlined_call_operand.hbm [shape: bf16[32,80], index: 1, kind: input, shape index: {}]   ;;  %s2154_s2 = inlined_call_operand.hbm [shape: bf16[32,80], index: 2, kind: input, shape index: {}]   ;;  %s2155_s3 = inlined_call_operand.hbm [shape: bf16[64,128], index: 3, kind: input, shape index: {}]   ;;  %s2156_s4 = inlined_call_operand.vmem [shape: f32[1,128], index: 4, kind: input, shape index: {}]   ;;  %s2157_s5 = inlined_call_operand.hbm [shape: bf16[128,128], index: 5, kind: input, shape index: {}]   ;;  %s2158_s6 = inlined_call_operand.vmem [shape: f32[1,128], index: 6, kind: input, shape index: {}]   ;;  %s2159_s7 = inlined_call_operand.hbm [shape: f32[32,128], index: 7, kind: output, shape index: {}]  }
   0x1   :  { %2170 = sst [smem:[#allocation21_spill]] %s2152_s0 }
   0x2   :  { %2171 = sst [smem:[#allocation22_spill]] %s2153_s1 }
   0x3   :  { %2172 = sst [smem:[#allocation23_spill]] %s2155_s3 }
   0x4   :  { %2173 = sst [smem:[#allocation24_spill]] %s2157_s5 }
   0x5   :  { %12 = vsyncpa [#allocation5], 0 }
   0x6   :  { %13 = vsyncpa [#allocation3], 0 }
   0x7   :  { %15 = vsyncpa [#allocation3 + $0x1], 0 }
   0x8   :  { %16 = vsyncpa [#allocation8], 0 }
   0x9   :  { %18 = vsyncpa [#allocation8 + $0x1], 0 }
   0xa   :  { %19 = vsyncpa [#allocation11], 0 }
   0xb   :  { %20 = vsyncpa [#allocation4], 0 }
   0xc   :  { %22 = vsyncpa [#allocation4 + $0x1], 0  ;;  %s1685_s24 = smov 0   ;;  %s1687_s25 = smov 0  }
   0xd   :  { %s1689_s26 = smov 0   ;;  %s1691_s27 = smov 0  }
   0xe LB: > { %s1706_s28 = sadd.s32 4294967295, %s1616_s27   ;;  %s1163_s29 = sadd.s32 4294967294, %s1616_s27   ;;  %s1616_s27 = sphi %s1691_s27, %s2206_s27   ;;  %s1612_s26 = sphi %s1689_s26, %s2205_s26   ;;  %s1608_s25 = sphi %s1687_s25, %s2204_s25   ;;  %s1604_s24 = sphi %s1685_s24, %s2203_s24  }
   0xf   : > { %p69_p0 = scmp.ne.s32.totalorder %s1608_s25, %s1604_s24  ;;  %p2160_p1 = scmp.eq.s32.totalorder %s1706_s28, 0 }
  0x10   : > { %p209_p3 = scmp.eq.s32.totalorder %s1163_s29, 1  ;;  %p1164_p5 = scmp.ge.s32.totalorder %s1616_s27, 1 }
  0x11   : > { %p1715_p4 = por %p2160_p1, %p69_p0  ;;  %p216_p7 = scmp.lt.s32.totalorder %s1616_s27, 3 }
  0x12   : > { %p1720_p6 = por %p209_p3, %p69_p0  ;;  %s1618_s10 = smov [#allocation9]  }
  0x13   : > { %s2174_s30 = scalar_select %p1715_p4, 1, 0 }
  0x14   : > { %s2175_s8 = scalar_select %p1720_p6, 1, 0 }
  0x15   : > { %p1725_p8 = pnand %p1164_p5, %p216_p7  ;;  %s237_s11 = sshll.u32 %s1618_s10, 4  ;;  %s1729_s11 = int_to_ptr.vmem [resolvable:$true] %s237_s11 }
  0x16   : > { %2176 = sst [smem:[#allocation19_spill]] %s2175_s8  ;;  %s1619_s13 = smov [#allocation10]  }
  0x17   : > { %p1308_p9 = pneg %p1725_p8  ;;  %s253_s14 = sshll.u32 %s1619_s13, 4  ;;  %s1740_s14 = int_to_ptr.vmem [resolvable:$true] %s253_s14 }
  0x18   : > { %s2179_s3 = sld [smem:[#allocation23_spill]] }
  0x19   : > { %p1736_p11 = pnand %p1308_p9, %p2160_p1 }
  0x1b   : > { %p1750_p13 = pneg %p1736_p11 }
  0x1e   : > { %s1405_s17 = scalar_lea.hbm %s2179_s3, 512 }
  0x1f   : > { %p1406_p12 = scmp.ne.s32.totalorder %s2179_s3, %s1405_s17  ;;  %p1412_p5 = scmp.lt.u32.totalorder %s1405_s17, %s2179_s3 }
  0x21   : > { %p1408_p0 = pnand %p1750_p13, %p1406_p12 }
  0x23   : > { %p1409_p3 = pneg %p1408_p0 }
  0x25   : > { %p1414_p7 = pnand %p1412_p5, %p1409_p3 }
  0x27   : > { %1417 = shalt.err (!%p1414_p7)
}
  0x28   : > { %s1418_s23 = scalar_lea.vmem %s1729_s11, 512  ;;  %p1426_p2 = scmp.lt.s32.totalorder %s1729_s11, %s1729_s11 }
  0x29   : > { %p1419_p9 = scmp.ne.s32.totalorder %s1729_s11, %s1418_s23  ;;  %p1427_p6 = scmp.lt.s32.totalorder %s1418_s23, %s1418_s23 }
  0x2b   : > { %p1421_p10 = pnand %p1419_p9, %p1750_p13  ;;  %p1428_p12 = por %p1427_p6, %p1426_p2 }
  0x2d   : > { %p1422_p1 = pneg %p1421_p10 }
  0x2f   : > { %p1429_p0 = pnand %p1428_p12, %p1422_p1 }
  0x31   : > { %1432 = shalt.err (!%p1429_p0)
}
  0x32   : > { %s2162_s29 = smov 64   ;;  %s2164_s10 = smov 4  }
  0x33   : > { %1314 = dma.hbm_to_vmem [thread:$0]  (!%p1736_p11), %s2179_s3, 512, %s1729_s11, [#allocation8], %s2162_s29, %s2162_s29, %s2164_s10  }
  0x34   : > { %s2181_s0 = sld [smem:[#allocation21_spill]] }
  0x3a   : > { %s1433_s18 = scalar_lea.hbm %s2181_s0, 16 }
  0x3b   : > { %p1434_p1 = scmp.ne.s32.totalorder %s2181_s0, %s1433_s18  ;;  %p1440_p10 = scmp.lt.u32.totalorder %s1433_s18, %s2181_s0 }
  0x3d   : > { %p1436_p2 = pnand %p1434_p1, %p1750_p13 }
  0x3f   : > { %p1437_p6 = pneg %p1436_p2 }
  0x41   : > { %p1442_p3 = pnand %p1440_p10, %p1437_p6 }
  0x43   : > { %1445 = shalt.err (!%p1442_p3)
}
  0x44   : > { %s1622_s8 = smov [#allocation2]   ;;  %s2182_s5 = sld [smem:[#allocation24_spill]] }
  0x45   : > { %1311 = dma.hbm_to_smem (!%p1736_p11), %s2181_s0, 16, %s1622_s8, [#allocation5]  }
  0x4a   : > { %s1446_s17 = scalar_lea.hbm %s2182_s5, 1024 }
  0x4b   : > { %p1447_p5 = scmp.ne.s32.totalorder %s2182_s5, %s1446_s17  ;;  %p1453_p12 = scmp.lt.u32.totalorder %s1446_s17, %s2182_s5 }
  0x4d   : > { %p1449_p7 = pnand %p1447_p5, %p1750_p13 }
  0x4f   : > { %p1450_p9 = pneg %p1449_p7 }
  0x51   : > { %p1455_p0 = pnand %p1453_p12, %p1450_p9 }
  0x53   : > { %1458 = shalt.err (!%p1455_p0)
}
  0x54   : > { %s1459_s8 = scalar_lea.vmem %s1740_s14, 1024  ;;  %p1467_p10 = scmp.lt.s32.totalorder %s1740_s14, %s1740_s14 }
  0x55   : > { %p1460_p1 = scmp.ne.s32.totalorder %s1740_s14, %s1459_s8  ;;  %p1468_p3 = scmp.lt.s32.totalorder %s1459_s8, %s1459_s8 }
  0x57   : > { %p1462_p2 = pnand %p1460_p1, %p1750_p13  ;;  %p1469_p5 = por %p1468_p3, %p1467_p10 }
  0x59   : > { %p1463_p6 = pneg %p1462_p2 }
  0x5b   : > { %p1470_p7 = pnand %p1469_p5, %p1463_p6 }
  0x5d   : > { %1473 = shalt.err (!%p1470_p7)
}
  0x5e   : > { %1317 = dma.hbm_to_vmem [thread:$0]  (!%p1736_p11), %s2182_s5, 1024, %s1740_s14, [#allocation11], %s2162_s29, %s2162_s29, %s2164_s10  }
  0x5f   : > { %s1817_s12 = sadd.s32 1, %s1616_s27   ;;  %s56_s13 = sadd.s32 1, %s1612_s26 }
  0x60   : > { %s53_s20 = ssub.s32 %s1616_s27, %s1817_s12  ;;  %p63_p9 = scmp.ne.s32.totalorder %s1612_s26, %s1608_s25 }
  0x61   : > { %p54_p13 = scmp.eq.s32.totalorder %s53_s20, 0  ;;  %p64_p12 = scmp.eq.s32.totalorder %s1616_s27, 0 }
  0x62   : > { %p1332_p0 = scmp.lt.s32.totalorder %s1616_s27, 2  ;;  %p2184_p2 = scmp.eq.s32.totalorder %s1706_s28, 1 }
  0x63   : > { %s1827_s15 = scalar_select %p54_p13, %s1612_s26, %s56_s13  }
  0x64   : > { %p65_p1 = por %p64_p12, %p63_p9  ;;  %p1831_p6 = por %p2184_p2, %p63_p9 }
  0x65   : > { %2183 = sst [smem:[#allocation20_spill]] %s1827_s15  ;;  %s270_s17 = sand.u32 1, %s1612_s26  }
  0x66   : > { %s2185_s16 = scalar_select %p1831_p6, 1, 0 }
  0x67   : > { %s1233_s19 = sshll.u32 %s1616_s27, 7  ;;  %s1837_s14 = sshll.u32 %s270_s17, 3 }
  0x68   : > { %s2186_s1 = sld [smem:[#allocation22_spill]]  ;;  %s274_s8 = scalar_lea.vmem [#allocation6], %s1837_s14 }
  0x69   : > { %s281_s23 = sshll.u32 %s274_s8, 4  ;;  %p1845_p11 = pnand %p1332_p0, %p65_p1  ;;  %s1849_s23 = int_to_ptr.vmem [resolvable:$true] %s281_s23 }
  0x6a   : > { %s1854_s21 = scalar_lea.hbm %s2154_s2, %s1233_s19  ;;  %s1856_s18 = scalar_lea.sflag [#allocation3], %s270_s17 }
  0x6b   : > { %p1476_p3 = pneg %p1845_p11 }
  0x6e   : > { %s1842_s22 = scalar_lea.hbm %s2186_s1, %s1233_s19  ;;  %s1479_s0 = scalar_lea.hbm %s2186_s1, 256 }
  0x6f   : > { %s1474_s29 = scalar_lea.hbm %s1842_s22, 128  ;;  %p1480_p13 = scmp.lt.u32.totalorder %s1842_s22, %s2186_s1 }
  0x70   : > { %p1475_p10 = scmp.ne.s32.totalorder %s1842_s22, %s1474_s29  ;;  %p1481_p9 = scmp.lt.u32.totalorder %s1479_s0, %s1474_s29 }
  0x71   : > { %p1483_p0 = scmp.lt.u32.totalorder %s1474_s29, %s1842_s22 }
  0x72   : > { %p1477_p5 = pnand %p1476_p3, %p1475_p10  ;;  %p1482_p12 = por %p1481_p9, %p1480_p13 }
  0x74   : > { %p1478_p7 = pneg %p1477_p5  ;;  %p1484_p1 = por %p1483_p0, %p1482_p12 }
  0x76   : > { %p1485_p2 = pnand %p1484_p1, %p1478_p7 }
  0x78   : > { %1488 = shalt.err (!%p1485_p2)
}
  0x79   : > { %s1489_s17 = scalar_lea.vmem %s1849_s23, 128  ;;  %s1623_s10 = smov [#allocation6]  }
  0x7a   : > { %p1490_p10 = scmp.ne.s32.totalorder %s1849_s23, %s1489_s17  ;;  %s1494_s19 = sshll.u32 %s1623_s10, 4  ;;  %s1495_s19 = int_to_ptr.vmem [resolvable:$false] %s1494_s19 }
  0x7b   : > { %s1496_s3 = scalar_lea.vmem %s1495_s19, 256  ;;  %p1497_p4 = scmp.lt.s32.totalorder %s1849_s23, %s1495_s19 }
  0x7c   : > { %p1492_p5 = pnand %p1490_p10, %p1476_p3  ;;  %p1498_p13 = scmp.lt.s32.totalorder %s1496_s3, %s1489_s17 }
  0x7e   : > { %p1493_p6 = pneg %p1492_p5  ;;  %p1499_p9 = por %p1498_p13, %p1497_p4 }
  0x80   : > { %p1500_p12 = pnand %p1499_p9, %p1493_p6 }
  0x82   : > { %1503 = shalt.err (!%p1500_p12)
}
  0x83   : > { %s2188_s0 = smov 4   ;;  %s2189_s5 = smov 64  }
  0x84   : > { %1321 = dma.hbm_to_vmem [thread:$0]  (!%p1845_p11), %s1842_s22, 128, %s1849_s23, %s1856_s18, %s2189_s5, %s2189_s5, %s2188_s0  }
  0x85   : > { %s295_s29 = scalar_lea.vmem [#allocation7], %s1837_s14  ;;  %s291_s13 = sand.u32 1, %s1616_s27  }
  0x86   : > { %s302_s20 = sshll.u32 %s295_s29, 4  ;;  %s1891_s8 = scalar_lea.sflag [#allocation8], %s291_s13  ;;  %s1889_s20 = int_to_ptr.vmem [resolvable:$true] %s302_s20 }
  0x87   : > { %s1504_s17 = scalar_lea.hbm %s1854_s21, 128  ;;  %s1509_s3 = scalar_lea.hbm %s2154_s2, 256 }
  0x88   : > { %p1505_p4 = scmp.ne.s32.totalorder %s1854_s21, %s1504_s17  ;;  %p1510_p0 = scmp.lt.u32.totalorder %s1854_s21, %s2154_s2 }
  0x89   : > { %p1511_p1 = scmp.lt.u32.totalorder %s1509_s3, %s1504_s17  ;;  %p1513_p10 = scmp.lt.u32.totalorder %s1504_s17, %s1854_s21 }
  0x8a   : > { %p1507_p6 = pnand %p1505_p4, %p1476_p3 }
  0x8b   : > { %p1512_p2 = por %p1511_p1, %p1510_p0 }
  0x8c   : > { %p1508_p7 = pneg %p1507_p6 }
  0x8d   : > { %p1514_p5 = por %p1513_p10, %p1512_p2 }
  0x8f   : > { %p1515_p13 = pnand %p1514_p5, %p1508_p7 }
  0x91   : > { %1518 = shalt.err (!%p1515_p13)
}
  0x92   : > { %s1519_s14 = scalar_lea.vmem %s1889_s20, 128  ;;  %s1624_s22 = smov [#allocation7]  }
  0x93   : > { %p1520_p9 = scmp.ne.s32.totalorder %s1889_s20, %s1519_s14  ;;  %s1524_s23 = sshll.u32 %s1624_s22, 4  ;;  %s1525_s23 = int_to_ptr.vmem [resolvable:$false] %s1524_s23 }
  0x94   : > { %s1526_s1 = scalar_lea.vmem %s1525_s23, 256  ;;  %p1527_p6 = scmp.lt.s32.totalorder %s1889_s20, %s1525_s23 }
  0x95   : > { %p1522_p12 = pnand %p1520_p9, %p1476_p3  ;;  %p1528_p0 = scmp.lt.s32.totalorder %s1526_s1, %s1519_s14 }
  0x97   : > { %p1523_p4 = pneg %p1522_p12  ;;  %p1529_p1 = por %p1528_p0, %p1527_p6 }
  0x99   : > { %p1530_p2 = pnand %p1529_p1, %p1523_p4 }
  0x9b   : > { %1533 = shalt.err (!%p1530_p2)
}
  0x9c   : > { %1324 = dma.hbm_to_vmem [thread:$0]  (!%p1845_p11), %s1854_s21, 128, %s1889_s20, %s1891_s8, %s2189_s5, %s2189_s5, %s2188_s0  }
  0x9d   : > { %314 = sbr.rel (%p1725_p8) target bundleno = 877 (0x36d), region = 48  ;;  %p2190_p3 = scmp.eq.s32.totalorder (!%p1725_p8), %s1706_s28, 0 }
  0xa4   : > { %1579 = dma.done.wait (%p2190_p3), [#allocation5], 16   ;;  %p2191_p7 = pmov %p2190_p3 }
  0xa5   : > { %s1927_s15 = sand.u32 1, %s1608_s25   ;;  %p2192_p11 = scmp.ne.s32.totalorder %s2174_s30, 0 }
  0xa6   : > { %1581 = vsyncadd (%p2191_p7), [#allocation5], 4294967280  ;;  %s1177_s11 = sshll.u32 %s1927_s15, 3  ;;  %s321_s18 = scalar_lea.sflag [#allocation3], %s1927_s15 }
  0xa7   : > { %s1931_s29 = scalar_lea.vmem [#allocation6], %s1177_s11 }
  0xa8   : > { %1583 = dma.done.wait (%p2192_p11), %s321_s18, 128  }
  0xa9   : > { %1585 = vsyncadd (%p2192_p11), %s321_s18, 4294967168  ;;  %s329_s9 = sand.u32 1, %s1706_s28   ;;  %s333_s0 = scalar_lea.vmem [#allocation7], %s1177_s11 }
  0xaa   : > { %s330_s21 = scalar_lea.sflag [#allocation8], %s329_s9 }
  0xab   : > { %1587 = dma.done.wait (%p2192_p11), %s330_s21, 128  }
  0xac   : > { %1589 = vsyncadd (%p2192_p11), %s330_s21, 4294967168  ;;  %p2193_p8 = pmov %p2190_p3 }
  0xad   : > { %p2194_p10 = pmov %p2190_p3 }
  0xae   : > { %1591 = dma.done.wait (%p2193_p8), [#allocation8], 512  }
  0xaf   : > { %1593 = vsyncadd (%p2194_p10), [#allocation8], 4294966784  ;;  %p2195_p5 = pmov %p2190_p3 }
  0xb0   : > { %p2196_p13 = pmov %p2190_p3 }
  0xb1   : > { %1595 = dma.done.wait (%p2195_p5), [#allocation11], 1024  }
  0xb2   : > { %1597 = vsyncadd (%p2196_p13), [#allocation11], 4294966272 }
  0xb3   : > { %346 = sfence }
  0xb4   : > { %v1241_v0 = vld [vmem:[%s333_s0] sm:$0xff]   ;;  %s1184_s5 = sld [smem:[#allocation2 + $0x4]]  ;;  %s1183_s20 = sld [smem:[#allocation2 + $0x2]]  ;;  %v1237_v46 = vld [vmem:[%s1931_s29] sm:$0xff]   ;;  %vm1641_vm0 = vmmov 0   ;;  %vm860_vm1 = vcmask 523264  }
  0xb5   : > { %s1185_s13 = sld [smem:[#allocation2 + $0x6]]  ;;  %v1950_v1 = vunpack.c.l.bf16 %v1241_v0  ;;  %v1952_v2 = vunpack.c.h.bf16 %v1241_v0  ;;  %s1186_s30 = sld [smem:[#allocation2 + $0x8]]  ;;  %v2011_v48 = vunpack.c.h.bf16 %v1237_v46  ;;  %v2015_v51 = vunpack.c.l.bf16 %v1237_v46  ;;  %v1400_v46 = vld [vmem:[#allocation10 + $0x18] sm:$0xff]  }
  0xb6   : > { %s1625_s8 = smov 126   ;;  %s1626_s17 = smov 127  }
  0xb7   : > { %s1187_s10 = sld [smem:[#allocation2 + $0xa]]  ;;  %s1188_s19 = sld [smem:[#allocation2 + $0xc]] }
  0xb8   : > { %s1627_s3 = smov 125   ;;  %s1189_s14 = sld [smem:[#allocation2 + $0xe]] }
  0xb9   : > { %s1628_s22 = smov 124   ;;  %s1190_s23 = sld [smem:[#allocation2 + $0x10]] }
  0xba   : > { %v413_v3 = vstv %s1184_s5  ;;  %v399_v5 = vstv %s1183_s20  ;;  %s1629_s1 = smov 123   ;;  %s1191_s11 = sld [smem:[#allocation2 + $0x12]] }
  0xbb   : > { %v414_v4 = vmul.f32 %v1950_v1, %v413_v3  ;;  %v400_v6 = vmul.f32 %v1950_v1, %v399_v5  ;;  %v415_v7 = vmul.f32 %v1952_v2, %v413_v3  ;;  %v401_v8 = vmul.f32 %v1952_v2, %v399_v5  ;;  %s1630_s18 = smov 122   ;;  %s1192_s9 = sld [smem:[#allocation2 + $0x14]] }
  0xbc   : > { %v427_v9 = vstv %s1185_s13  ;;  %v441_v12 = vstv %s1186_s30  ;;  %s1631_s21 = smov 121   ;;  %s1193_s0 = sld [smem:[#allocation2 + $0x16]] }
  0xbd   : > { %418 = vrot.lane.b32.xlu1 %v414_v4, %s1625_s8  ;;  %404 = vrot.lane.b32.xlu0 %v400_v6, %s1626_s17  ;;  %v429_v10 = vmul.f32 %v1952_v2, %v427_v9  ;;  %v428_v11 = vmul.f32 %v1950_v1, %v427_v9  ;;  %v443_v13 = vmul.f32 %v1952_v2, %v441_v12  ;;  %v455_v15 = vstv %s1187_s10  ;;  %s1632_s5 = smov 120   ;;  %s1194_s20 = sld [smem:[#allocation2 + $0x18]] }
  0xbe   : > { %v442_v14 = vmul.f32 %v1950_v1, %v441_v12  ;;  %v457_v16 = vmul.f32 %v1952_v2, %v455_v15  ;;  %v456_v17 = vmul.f32 %v1950_v1, %v455_v15  ;;  %v469_v18 = vstv %s1188_s19  ;;  %s1633_s13 = smov 119   ;;  %s1195_s30 = sld [smem:[#allocation2 + $0x1a]] }
  0xbf   : > { %v471_v19 = vmul.f32 %v1952_v2, %v469_v18  ;;  %v470_v20 = vmul.f32 %v1950_v1, %v469_v18  ;;  %v483_v21 = vstv %s1189_s14  ;;  %v497_v24 = vstv %s1190_s23  ;;  %s1634_s10 = smov 118   ;;  %s1196_s19 = sld [smem:[#allocation2 + $0x1c]]  ;;  %v1393_v18 = vld [vmem:[#allocation9] sm:$0xff]  }
  0xc0   : > { %v485_v22 = vmul.f32 %v1952_v2, %v483_v21  ;;  %v484_v23 = vmul.f32 %v1950_v1, %v483_v21  ;;  %v499_v25 = vmul.f32 %v1952_v2, %v497_v24  ;;  %v498_v26 = vmul.f32 %v1950_v1, %v497_v24  ;;  %s1635_s14 = smov 117   ;;  %s1197_s23 = sld [smem:[#allocation2 + $0x1e]] }
  0xc1   : > { %420 = vrot.lane.b32.xlu1 %v415_v7, %s1625_s8  ;;  %406 = vrot.lane.b32.xlu0 %v401_v8, %s1626_s17  ;;  %v511_v27 = vstv %s1191_s11  ;;  %v525_v30 = vstv %s1192_s9  ;;  %s1636_s11 = smov 116   ;;  %s1198_s9 = sld [smem:[#allocation2 + $0x1]]  ;;  %v1640_v21 = vmov 0.0  }
  0xc2   : > { %v513_v28 = vmul.f32 %v1952_v2, %v511_v27  ;;  %v512_v29 = vmul.f32 %v1950_v1, %v511_v27  ;;  %v527_v31 = vmul.f32 %v1952_v2, %v525_v30  ;;  %v526_v32 = vmul.f32 %v1950_v1, %v525_v30  ;;  %s1201_s29 = sld [smem:[#allocation2 + $0x7]]  ;;  %1258 = vmatprep.subr.bf16.mxu0 %v1640_v21  ;;  %v1395_v27 = vld [vmem:[#allocation9 + $0x10] sm:$0xff]   ;;  %p2198_p12 = scmp.ne.s32.totalorder %s2185_s16, 0 }
  0xc3   : > { %v539_v33 = vstv %s1193_s0  ;;  %v553_v36 = vstv %s1194_s20  ;;  %s2168_s0 = smov 115   ;;  %s1199_s20 = sld [smem:[#allocation2 + $0x3]]  ;;  %1259 = vmatpush3.bf16.msra.mxu0 %v1393_v18  ;;  %1270 = vmatprep.subr.bf16.mxu1 %v1640_v21 }
  0xc4   : > { %v541_v34 = vmul.f32 %v1952_v2, %v539_v33  ;;  %v540_v35 = vmul.f32 %v1950_v1, %v539_v33  ;;  %v555_v37 = vmul.f32 %v1952_v2, %v553_v36  ;;  %v554_v38 = vmul.f32 %v1950_v1, %v553_v36  ;;  %1260 = vmatprep.subr.bf16.mxu0 %v1640_v21  ;;  %v1396_v33 = vld [vmem:[#allocation9 + $0x18] sm:$0xff]  }
  0xc5   : > { %434 = vrot.lane.b32.xlu1 %v429_v10, %s1627_s3  ;;  %432 = vrot.lane.b32.xlu0 %v428_v11, %s1627_s3  ;;  %v567_v39 = vstv %s1195_s30  ;;  %v581_v42 = vstv %s1196_s19  ;;  %s1638_s30 = smov 114   ;;  %s1200_s19 = sld [smem:[#allocation2 + $0x5]] }
  0xc6   : > { %v569_v40 = vmul.f32 %v1952_v2, %v567_v39  ;;  %v568_v41 = vmul.f32 %v1950_v1, %v567_v39  ;;  %v583_v43 = vmul.f32 %v1952_v2, %v581_v42  ;;  %v582_v44 = vmul.f32 %v1950_v1, %v581_v42  ;;  %1266 = vmatprep.mubr.msk.bf16.mxu0 %vm1641_vm0, %v1640_v21  ;;  %v1398_v39 = vld [vmem:[#allocation10 + $0x8] sm:$0xff]  }
  0xc7   : > { %v595_v45 = vstv %s1197_s23  ;;  %v609_v50 = vstv %s1198_s9  ;;  %s1202_s23 = sld [smem:[#allocation2 + $0x9]]  ;;  %s1203_s9 = sld [smem:[#allocation2 + $0xb]]  ;;  %1286 = vmatprep.mubr.msk.bf16.mxu1 %vm1641_vm0, %v1640_v21 }
  0xc8   : > { %v597_v47 = vmul.f32 %v1952_v2, %v595_v45  ;;  %v596_v49 = vmul.f32 %v1950_v1, %v595_v45  ;;  %v611_v52 = vmul.f32 %v2011_v48, %v609_v50  ;;  %v610_v53 = vmul.f32 %v2015_v51, %v609_v50 }
  0xc9   : > { %448 = vrot.lane.b32.xlu1 %v443_v13, %s1628_s22  ;;  %446 = vrot.lane.b32.xlu0 %v442_v14, %s1628_s22  ;;  %v623_v54 = vstv %s1199_s20  ;;  %v651_v60 = vstv %s1201_s29 }
  0xca   : > { %v625_v55 = vmul.f32 %v2011_v48, %v623_v54  ;;  %v624_v56 = vmul.f32 %v2015_v51, %v623_v54  ;;  %v653_v61 = vmul.f32 %v2011_v48, %v651_v60  ;;  %v652_v62 = vmul.f32 %v2015_v51, %v651_v60 }
  0xcb   : > { %v637_v57 = vstv %s1200_s19 }
  0xcc   : > { %v639_v58 = vmul.f32 %v2011_v48, %v637_v57  ;;  %v638_v59 = vmul.f32 %v2015_v51, %v637_v57 }
  0xcd   : > { %462 = vrot.lane.b32.xlu1 %v457_v16, %s1629_s1  ;;  %460 = vrot.lane.b32.xlu0 %v456_v17, %s1629_s1  ;;  %v665_v63 = vstv %s1202_s23  ;;  %v679_v4 = vstv %s1203_s9 }
  0xce   : > { %v667_v0 = vmul.f32 %v2011_v48, %v665_v63  ;;  %v666_v3 = vmul.f32 %v2015_v51, %v665_v63  ;;  %v681_v5 = vmul.f32 %v2011_v48, %v679_v4  ;;  %v680_v6 = vmul.f32 %v2015_v51, %v679_v4 }
  0xd1   : > { %476 = vrot.lane.b32.xlu1 %v471_v19, %s1630_s18  ;;  %474 = vrot.lane.b32.xlu0 %v470_v20, %s1630_s18 }
  0xd5   : > { %490 = vrot.lane.b32.xlu1 %v485_v22, %s1631_s21  ;;  %488 = vrot.lane.b32.xlu0 %v484_v23, %s1631_s21  ;;  %v1394_v23 = vld [vmem:[#allocation9 + $0x8] sm:$0xff]  }
  0xd6   : > { %1261 = vmatpush3.bf16.msra.mxu0 %v1394_v23 }
  0xd7   : > { %1262 = vmatprep.subr.bf16.mxu0 %v1640_v21 }
  0xd9   : > { %504 = vrot.lane.b32.xlu1 %v499_v25, %s1632_s5  ;;  %502 = vrot.lane.b32.xlu0 %v498_v26, %s1632_s5 }
  0xda   : > { %1263 = vmatpush3.bf16.msra.mxu0 %v1395_v27 }
  0xdb   : > { %1264 = vmatprep.subr.bf16.mxu0 %v1640_v21 }
  0xdd   : > { %518 = vrot.lane.b32.xlu1 %v513_v28, %s1633_s13  ;;  %516 = vrot.lane.b32.xlu0 %v512_v29, %s1633_s13 }
  0xde   : > { %1265 = vmatpush3.bf16.msra.mxu0 %v1396_v33 }
  0xe1   : > { %532 = vrot.lane.b32.xlu1 %v527_v31, %s1634_s10  ;;  %530 = vrot.lane.b32.xlu0 %v526_v32, %s1634_s10 }
  0xe5   : > { %546 = vrot.lane.b32.xlu1 %v541_v34, %s1635_s14  ;;  %544 = vrot.lane.b32.xlu0 %v540_v35, %s1635_s14 }
  0xe9   : > { %560 = vrot.lane.b32.xlu1 %v555_v37, %s1636_s11  ;;  %558 = vrot.lane.b32.xlu0 %v554_v38, %s1636_s11  ;;  %v1397_v37 = vld [vmem:[#allocation10] sm:$0xff]  }
  0xea   : > { %1271 = vmatpush3.bf16.msra.mxu1 %v1397_v37 }
  0xeb   : > { %1272 = vmatprep.subr.bf16.mxu1 %v1640_v21 }
  0xed   : > { %574 = vrot.lane.b32.xlu1 %v569_v40, %s2168_s0  ;;  %572 = vrot.lane.b32.xlu0 %v568_v41, %s2168_s0  ;;  %s1639_s0 = smov 113  }
  0xee   : > { %1273 = vmatpush3.bf16.msra.mxu1 %v1398_v39 }
  0xef   : > { %1274 = vmatprep.subr.bf16.mxu1 %v1640_v21 }
  0xf1   : > { %588 = vrot.lane.b32.xlu1 %v583_v43, %s1638_s30  ;;  %586 = vrot.lane.b32.xlu0 %v582_v44, %s1638_s30  ;;  %v1399_v43 = vld [vmem:[#allocation10 + $0x10] sm:$0xff]  }
  0xf2   : > { %1275 = vmatpush3.bf16.msra.mxu1 %v1399_v43 }
  0xf3   : > { %1276 = vmatprep.subr.bf16.mxu1 %v1640_v21 }
  0xf5   : > { %602 = vrot.lane.b32.xlu1 %v597_v47, %s1639_s0  ;;  %600 = vrot.lane.b32.xlu0 %v596_v49, %s1639_s0  ;;  %v1401_v49 = vld [vmem:[#allocation10 + $0x20] sm:$0xff]  }
  0xf6   : > { %1277 = vmatpush3.bf16.msra.mxu1 %v1400_v46 }
  0xf7   : > { %1278 = vmatprep.subr.bf16.mxu1 %v1640_v21 }
  0xf9   : > { %616 = vrot.lane.b32.xlu1 %v611_v52, %s1626_s17  ;;  %614 = vrot.lane.b32.xlu0 %v610_v53, %s1626_s17  ;;  %s1204_s17 = sld [smem:[#allocation2 + $0xd]]  ;;  %v1402_v52 = vld [vmem:[#allocation10 + $0x28] sm:$0xff]  }
  0xfa   : > { %1279 = vmatpush3.bf16.msra.mxu1 %v1401_v49 }
  0xfb   : > { %1280 = vmatprep.subr.bf16.mxu1 %v1640_v21 }
  0xfd   : > { %630 = vrot.lane.b32.xlu1 %v625_v55, %s1625_s8  ;;  %628 = vrot.lane.b32.xlu0 %v624_v56, %s1625_s8  ;;  %s1205_s8 = sld [smem:[#allocation2 + $0xf]] }
  0xfe   : > { %1281 = vmatpush3.bf16.msra.mxu1 %v1402_v52 }
  0xff   : > { %v693_v7 = vstv %s1204_s17  ;;  %1282 = vmatprep.subr.bf16.mxu1 %v1640_v21  ;;  %s1235_s17 = sshll.u32 %s1706_s28, 8 }
 0x100   : > { %v695_v8 = vmul.f32 %v2011_v48, %v693_v7  ;;  %v694_v9 = vmul.f32 %v2015_v51, %v693_v7 }
 0x101   : > { %644 = vrot.lane.b32.xlu1 %v639_v58, %s1627_s3  ;;  %642 = vrot.lane.b32.xlu0 %v638_v59, %s1627_s3  ;;  %s1206_s3 = sld [smem:[#allocation2 + $0x11]] }
 0x103   : > { %v707_v10 = vstv %s1205_s8 }
 0x104   : > { %v709_v11 = vmul.f32 %v2011_v48, %v707_v10  ;;  %v708_v12 = vmul.f32 %v2015_v51, %v707_v10 }
 0x105   : > { %658 = vrot.lane.b32.xlu1 %v653_v61, %s1628_s22  ;;  %656 = vrot.lane.b32.xlu0 %v652_v62, %s1628_s22  ;;  %s1207_s22 = sld [smem:[#allocation2 + $0x13]] }
 0x107   : > { %v721_v13 = vstv %s1206_s3 }
 0x108   : > { %v723_v14 = vmul.f32 %v2011_v48, %v721_v13  ;;  %v722_v15 = vmul.f32 %v2015_v51, %v721_v13 }
 0x109   : > { %672 = vrot.lane.b32.xlu1 %v667_v0, %s1629_s1  ;;  %670 = vrot.lane.b32.xlu0 %v666_v3, %s1629_s1  ;;  %s1208_s1 = sld [smem:[#allocation2 + $0x15]] }
 0x10b   : > { %v735_v16 = vstv %s1207_s22  ;;  %s2108_s22 = scalar_lea.hbm %s2159_s7, %s1235_s17 }
 0x10c   : > { %v737_v17 = vmul.f32 %v2011_v48, %v735_v16  ;;  %v736_v19 = vmul.f32 %v2015_v51, %v735_v16 }
 0x10d   : > { %686 = vrot.lane.b32.xlu1 %v681_v5, %s1630_s18  ;;  %684 = vrot.lane.b32.xlu0 %v680_v6, %s1630_s18  ;;  %s1209_s18 = sld [smem:[#allocation2 + $0x17]] }
 0x10f   : > { %v749_v20 = vstv %s1208_s1  ;;  %s1023_s1 = scalar_lea.sflag [#allocation4], %s1927_s15 }
 0x110   : > { %v751_v22 = vmul.f32 %v2011_v48, %v749_v20  ;;  %v750_v24 = vmul.f32 %v2015_v51, %v749_v20 }
 0x111   : > { %700 = vrot.lane.b32.xlu1 %v695_v8, %s1631_s21  ;;  %698 = vrot.lane.b32.xlu0 %v694_v9, %s1631_s21  ;;  %s1210_s21 = sld [smem:[#allocation2 + $0x19]] }
 0x113   : > { %v763_v25 = vstv %s1209_s18  ;;  %s1642_s18 = smov [#allocation12]  }
 0x114   : > { %v765_v26 = vmul.f32 %v2011_v48, %v763_v25  ;;  %v764_v28 = vmul.f32 %v2015_v51, %v763_v25 }
 0x115   : > { %714 = vrot.lane.b32.xlu1 %v709_v11, %s1632_s5  ;;  %712 = vrot.lane.b32.xlu0 %v708_v12, %s1632_s5  ;;  %s1211_s5 = sld [smem:[#allocation2 + $0x1b]] }
 0x117   : > { %v777_v29 = vstv %s1210_s21  ;;  %s1538_s21 = sshll.u32 %s1642_s18, 4  ;;  %s1539_s21 = int_to_ptr.vmem [resolvable:$false] %s1538_s21 }
 0x118   : > { %v779_v30 = vmul.f32 %v2011_v48, %v777_v29  ;;  %v778_v31 = vmul.f32 %v2015_v51, %v777_v29 }
 0x119   : > { %728 = vrot.lane.b32.xlu1 %v723_v14, %s1633_s13  ;;  %726 = vrot.lane.b32.xlu0 %v722_v15, %s1633_s13  ;;  %s1212_s13 = sld [smem:[#allocation2 + $0x1d]] }
 0x11b   : > { %v791_v32 = vstv %s1211_s5  ;;  %s1540_s5 = scalar_lea.vmem %s1539_s21, 512 }
 0x11c   : > { %v793_v34 = vmul.f32 %v2011_v48, %v791_v32  ;;  %v792_v35 = vmul.f32 %v2015_v51, %v791_v32 }
 0x11d   : > { %742 = vrot.lane.b32.xlu1 %v737_v17, %s1634_s10  ;;  %740 = vrot.lane.b32.xlu0 %v736_v19, %s1634_s10  ;;  %s2197_s10 = smov 115  }
 0x11f   : > { %v805_v36 = vstv %s1212_s13 }
 0x120   : > { %v807_v38 = vmul.f32 %v2011_v48, %v805_v36  ;;  %v806_v40 = vmul.f32 %v2015_v51, %v805_v36 }
 0x121   : > { %756 = vrot.lane.b32.xlu1 %v751_v22, %s1635_s14  ;;  %754 = vrot.lane.b32.xlu0 %v750_v24, %s1635_s14  ;;  %s392_s14 = sld [smem:[#allocation2]] }
 0x125   : > { %770 = vrot.lane.b32.xlu1 %v765_v26, %s1636_s11  ;;  %768 = vrot.lane.b32.xlu0 %v764_v28, %s1636_s11  ;;  %s1182_s11 = sld [smem:[#allocation2 + $0x1f]] }
 0x127   : > { %v393_v7 = vstv %s392_s14 }
 0x128   : > { %v395_v8 = vmul.f32 %v1952_v2, %v393_v7  ;;  %v394_v12 = vmul.f32 %v1950_v1, %v393_v7 }
 0x129   : > { %784 = vrot.lane.b32.xlu1 %v779_v30, %s2197_s10  ;;  %782 = vrot.lane.b32.xlu0 %v778_v31, %s2197_s10 }
 0x12b   : > { %v391_v11 = vstv %s1182_s11 }
 0x12c   : > { %v397_v13 = vadd.f32 %v395_v8, %v391_v11  ;;  %v396_v16 = vadd.f32 %v394_v12, %v391_v11 }
 0x12d   : > { %798 = vrot.lane.b32.xlu1 %v793_v34, %s1638_s30  ;;  %796 = vrot.lane.b32.xlu0 %v792_v35, %s1638_s30  ;;  %s1181_s30 = sshll.u32 %s1927_s15, 4 }
 0x12e   : > { %s377_s23 = scalar_lea.vmem [#allocation12], %s1181_s30 }
 0x12f   : > { %v419_v41 = vpop.permute.xlu1 %418  ;;  %v405_v42 = vpop.permute.xlu0 %404  ;;  %s1036_s9 = sshll.u32 %s377_s23, 4  ;;  %s2103_s9 = int_to_ptr.vmem [resolvable:$true] %s1036_s9 }
 0x130   : > { %v410_v20 = vadd.f32 %v405_v42, %v396_v16  ;;  %s1534_s28 = scalar_lea.vmem %s2103_s9, 256  ;;  %p1541_p0 = scmp.lt.s32.totalorder %s2103_s9, %s1539_s21 }
 0x131   : > { %812 = vrot.lane.b32.xlu1 %v807_v38, %s1639_s0  ;;  %810 = vrot.lane.b32.xlu0 %v806_v40, %s1639_s0  ;;  %p1535_p9 = scmp.ne.s32.totalorder %s2103_s9, %s1534_s28  ;;  %p1542_p1 = scmp.lt.s32.totalorder %s1540_s5, %s1534_s28 }
 0x132   : > { %v424_v25 = vadd.f32 %v419_v41, %v410_v20 }
 0x133   : > { %v421_v44 = vpop.permute.xlu1 %420  ;;  %v407_v45 = vpop.permute.xlu0 %406  ;;  %p1536_p4 = pnand %p1535_p9, %p2198_p12  ;;  %p1543_p2 = por %p1542_p1, %p1541_p0 }
 0x134   : > { %v411_v17 = vadd.f32 %v407_v45, %v397_v13 }
 0x135   : > { %p1537_p6 = pneg %p1536_p4 }
 0x136   : > { %v425_v22 = vadd.f32 %v421_v44, %v411_v17 }
 0x137   : > { %v435_v47 = vpop.permute.xlu1 %434  ;;  %v433_v48 = vpop.permute.xlu0 %432  ;;  %p1544_p3 = pnand %p1543_p2, %p1537_p6 }
 0x138   : > { %v439_v26 = vadd.f32 %v435_v47, %v425_v22  ;;  %v438_v27 = vadd.f32 %v433_v48, %v424_v25 }
 0x13b   : > { %v449_v50 = vpop.permute.xlu1 %448  ;;  %v447_v51 = vpop.permute.xlu0 %446 }
 0x13c   : > { %v453_v28 = vadd.f32 %v449_v50, %v439_v26  ;;  %v452_v30 = vadd.f32 %v447_v51, %v438_v27 }
 0x13f   : > { %v463_v53 = vpop.permute.xlu1 %462  ;;  %v461_v54 = vpop.permute.xlu0 %460 }
 0x140   : > { %v467_v31 = vadd.f32 %v463_v53, %v453_v28  ;;  %v466_v1 = vadd.f32 %v461_v54, %v452_v30 }
 0x143   : > { %v477_v55 = vpop.permute.xlu1 %476  ;;  %v475_v56 = vpop.permute.xlu0 %474 }
 0x144   : > { %v481_v33 = vadd.f32 %v477_v55, %v467_v31  ;;  %v480_v35 = vadd.f32 %v475_v56, %v466_v1 }
 0x147   : > { %v491_v57 = vpop.permute.xlu1 %490  ;;  %v489_v58 = vpop.permute.xlu0 %488 }
 0x148   : > { %v495_v36 = vadd.f32 %v491_v57, %v481_v33  ;;  %v494_v37 = vadd.f32 %v489_v58, %v480_v35 }
 0x14b   : > { %v505_v59 = vpop.permute.xlu1 %504  ;;  %v503_v60 = vpop.permute.xlu0 %502 }
 0x14c   : > { %v509_v39 = vadd.f32 %v505_v59, %v495_v36  ;;  %v508_v42 = vadd.f32 %v503_v60, %v494_v37 }
 0x14f   : > { %v519_v61 = vpop.permute.xlu1 %518  ;;  %v517_v62 = vpop.permute.xlu0 %516 }
 0x150   : > { %v523_v43 = vadd.f32 %v519_v61, %v509_v39  ;;  %v522_v41 = vadd.f32 %v517_v62, %v508_v42 }
 0x153   : > { %v533_v63 = vpop.permute.xlu1 %532  ;;  %v531_v0 = vpop.permute.xlu0 %530 }
 0x154   : > { %v537_v45 = vadd.f32 %v533_v63, %v523_v43  ;;  %v536_v47 = vadd.f32 %v531_v0, %v522_v41 }
 0x157   : > { %v547_v3 = vpop.permute.xlu1 %546  ;;  %v545_v4 = vpop.permute.xlu0 %544 }
 0x158   : > { %v551_v48 = vadd.f32 %v547_v3, %v537_v45  ;;  %v550_v49 = vadd.f32 %v545_v4, %v536_v47 }
 0x15b   : > { %v561_v5 = vpop.permute.xlu1 %560  ;;  %v559_v6 = vpop.permute.xlu0 %558 }
 0x15c   : > { %v565_v51 = vadd.f32 %v561_v5, %v551_v48  ;;  %v564_v53 = vadd.f32 %v559_v6, %v550_v49  ;;  %v1403_v48 = vld [vmem:[#allocation10 + $0x30] sm:$0xff]   ;;  %v1404_v49 = vld [vmem:[#allocation10 + $0x38] sm:$0xff]  }
 0x15d   : > { %1283 = vmatpush3.bf16.msra.mxu1 %v1403_v48 }
 0x15e   : > { %1284 = vmatprep.subr.bf16.mxu1 %v1640_v21  ;;  %v1219_v21 = vld [vmem:[%s2158_s6] ss:$0 sm:$0xff] }
 0x15f   : > { %v575_v9 = vpop.permute.xlu1 %574  ;;  %v573_v10 = vpop.permute.xlu0 %572 }
 0x160   : > { %v579_v54 = vadd.f32 %v575_v9, %v565_v51  ;;  %v578_v55 = vadd.f32 %v573_v10, %v564_v53 }
 0x161   : > { %1285 = vmatpush3.bf16.msra.mxu1 %v1404_v49 }
 0x163   : > { %v589_v14 = vpop.permute.xlu1 %588  ;;  %v587_v15 = vpop.permute.xlu0 %586 }
 0x164   : > { %v593_v57 = vadd.f32 %v589_v14, %v579_v54  ;;  %v592_v59 = vadd.f32 %v587_v15, %v578_v55 }
 0x167   : > { %v603_v18 = vpop.permute.xlu1 %602  ;;  %v601_v19 = vpop.permute.xlu0 %600 }
 0x168   : > { %v607_v7 = vadd.f32 %v603_v18, %v593_v57  ;;  %v606_v60 = vadd.f32 %v601_v19, %v592_v59 }
 0x16b   : > { %v617_v23 = vpop.permute.xlu1 %616  ;;  %v615_v24 = vpop.permute.xlu0 %614 }
 0x16c   : > { %v621_v62 = vadd.f32 %v617_v23, %v607_v7  ;;  %v620_v63 = vadd.f32 %v615_v24, %v606_v60 }
 0x16f   : > { %v631_v2 = vpop.permute.xlu1 %630  ;;  %v629_v29 = vpop.permute.xlu0 %628 }
 0x170   : > { %v635_v11 = vadd.f32 %v631_v2, %v621_v62  ;;  %v634_v0 = vadd.f32 %v629_v29, %v620_v63 }
 0x173   : > { %v645_v32 = vpop.permute.xlu1 %644  ;;  %v643_v34 = vpop.permute.xlu0 %642 }
 0x174   : > { %v649_v4 = vadd.f32 %v645_v32, %v635_v11  ;;  %v648_v5 = vadd.f32 %v643_v34, %v634_v0 }
 0x177   : > { %v659_v38 = vpop.permute.xlu1 %658  ;;  %v657_v40 = vpop.permute.xlu0 %656 }
 0x178   : > { %v663_v13 = vadd.f32 %v659_v38, %v649_v4  ;;  %v662_v6 = vadd.f32 %v657_v40, %v648_v5 }
 0x17b   : > { %v673_v44 = vpop.permute.xlu1 %672  ;;  %v671_v46 = vpop.permute.xlu0 %670 }
 0x17c   : > { %v677_v10 = vadd.f32 %v673_v44, %v663_v13  ;;  %v676_v14 = vadd.f32 %v671_v46, %v662_v6 }
 0x17f   : > { %v687_v50 = vpop.permute.xlu1 %686  ;;  %v685_v52 = vpop.permute.xlu0 %684 }
 0x180   : > { %v691_v17 = vadd.f32 %v687_v50, %v677_v10  ;;  %v690_v15 = vadd.f32 %v685_v52, %v676_v14  ;;  %v1213_v50 = vld [vmem:[%s2156_s4] ss:$0 sm:$0xff] }
 0x183   : > { %v701_v56 = vpop.permute.xlu1 %700  ;;  %v699_v58 = vpop.permute.xlu0 %698 }
 0x184   : > { %v705_v19 = vadd.f32 %v701_v56, %v691_v17  ;;  %v704_v22 = vadd.f32 %v699_v58, %v690_v15 }
 0x187   : > { %v715_v61 = vpop.permute.xlu1 %714  ;;  %v713_v8 = vpop.permute.xlu0 %712 }
 0x188   : > { %v719_v23 = vadd.f32 %v715_v61, %v705_v19  ;;  %v718_v24 = vadd.f32 %v713_v8, %v704_v22 }
 0x18b   : > { %v729_v3 = vpop.permute.xlu1 %728  ;;  %v727_v12 = vpop.permute.xlu0 %726 }
 0x18c   : > { %v733_v26 = vadd.f32 %v729_v3, %v719_v23  ;;  %v732_v2 = vadd.f32 %v727_v12, %v718_v24 }
 0x18f   : > { %v743_v9 = vpop.permute.xlu1 %742  ;;  %v741_v16 = vpop.permute.xlu0 %740 }
 0x190   : > { %v747_v28 = vadd.f32 %v743_v9, %v733_v26  ;;  %v746_v29 = vadd.f32 %v741_v16, %v732_v2 }
 0x193   : > { %v757_v18 = vpop.permute.xlu1 %756  ;;  %v755_v20 = vpop.permute.xlu0 %754 }
 0x194   : > { %v761_v31 = vadd.f32 %v757_v18, %v747_v28  ;;  %v760_v32 = vadd.f32 %v755_v20, %v746_v29 }
 0x197   : > { %v771_v25 = vpop.permute.xlu1 %770  ;;  %v769_v27 = vpop.permute.xlu0 %768 }
 0x198   : > { %v775_v33 = vadd.f32 %v771_v25, %v761_v31  ;;  %v774_v34 = vadd.f32 %v769_v27, %v760_v32 }
 0x19b   : > { %v785_v30 = vpop.permute.xlu1 %784  ;;  %v783_v1 = vpop.permute.xlu0 %782 }
 0x19c   : > { %v789_v36 = vadd.f32 %v785_v30, %v775_v33  ;;  %v788_v38 = vadd.f32 %v783_v1, %v774_v34 }
 0x19f   : > { %v799_v35 = vpop.permute.xlu1 %798  ;;  %v797_v37 = vpop.permute.xlu0 %796 }
 0x1a0   : > { %v803_v39 = vadd.f32 %v799_v35, %v789_v36  ;;  %v802_v40 = vadd.f32 %v797_v37, %v788_v38 }
 0x1a3   : > { %v813_v42 = vpop.permute.xlu1 %812  ;;  %v811_v41 = vpop.permute.xlu0 %810 }
 0x1a4   : > { %v817_v43 = vadd.f32 %v813_v42, %v803_v39  ;;  %v816_v44 = vadd.f32 %v811_v41, %v802_v40 }
 0x1a6   : > { %v819_v45 = vmax.f32 %v817_v43, 0.0  ;;  %v818_v46 = vmax.f32 %v816_v44, 0.0 }
 0x1a8   : > { %v820_v47 = vpack.c.bf16 %v819_v45, %v818_v46 }
 0x1aa   : > { %1267 = vmatmul.mubr.msk.bf16.vlgmr.msra.gmra.mrb[0].mxu0 %vm860_vm1, %v820_v47 }
 0x27d   : > { %v898_v51 = vpop.f32.mrb[0].mxu0 }
 0x27e   : > { %v899_v52 = vadd.f32 %v1213_v50, %v898_v51  ;;  %v1268_v53 = vpop.f32.mrb[1].mxu0 }
 0x27f   : > { %v901_v54 = vpop.f32.mrb[2].mxu0 }
 0x280   : > { %v902_v55 = vadd.f32 %v1213_v50, %v901_v54  ;;  %v1269_v56 = vpop.f32.mrb[3].mxu0  ;;  %v905_v57 = vmax.f32 %v899_v52, 0.0 }
 0x282   : > { %v906_v58 = vmax.f32 %v902_v55, 0.0 }
 0x284   : > { %v907_v59 = vpack.c.bf16 %v906_v58, %v905_v57 }
 0x286   : > { %1287 = vmatmul.mubr.bf16.vlgmr.msra.gmra.mrb[0].mxu1 %v907_v59 }
 0x359   : > { %v1013_v7 = vpop.f32.mrb[0].mxu1 }
 0x35a   : > { %v1014_v60 = vadd.f32 %v1219_v21, %v1013_v7  ;;  %v1288_v61 = vpop.f32.mrb[1].mxu1 }
 0x35b   : > { %v1016_v62 = vpop.f32.mrb[2].mxu1 }
 0x35c   : > { %1020 = vst [vmem:[%s377_s23] sm:$0xff] %v1014_v60  ;;  %v1017_v8 = vadd.f32 %v1219_v21, %v1016_v62  ;;  %v1289_v63 = vpop.f32.mrb[3].mxu1 }
 0x35e   : > { %1021 = vst [vmem:[%s377_s23 + $0x8] sm:$0xff] %v1017_v8 }
 0x35f   : > { %1547 = shalt.err (!%p1544_p3)
}
 0x360   : > { %s1548_s13 = scalar_lea.hbm %s2108_s22, 256  ;;  %s1552_s11 = scalar_lea.hbm %s2159_s7, 512 }
 0x361   : > { %p1549_p7 = scmp.ne.s32.totalorder %s2108_s22, %s1548_s13  ;;  %p1553_p10 = scmp.lt.u32.totalorder %s2108_s22, %s2159_s7 }
 0x362   : > { %p1554_p5 = scmp.lt.u32.totalorder %s1552_s11, %s1548_s13  ;;  %p1556_p9 = scmp.lt.u32.totalorder %s1548_s13, %s2108_s22 }
 0x363   : > { %p1550_p11 = pnand %p1549_p7, %p2198_p12 }
 0x364   : > { %p1555_p13 = por %p1554_p5, %p1553_p10 }
 0x365   : > { %p1551_p8 = pneg %p1550_p11 }
 0x366   : > { %p1557_p4 = por %p1556_p9, %p1555_p13 }
 0x368   : > { %p1558_p6 = pnand %p1557_p4, %p1551_p8 }
 0x36a   : > { %1561 = shalt.err (!%p1558_p6)
}
 0x36b   : > { %s1643_s30 = smov 128   ;;  %s1644_s19 = smov 8  }
 0x36c   : > { %1306 = dma.vmem_to_hbm [thread:$0]  (%p2198_p12), %s2103_s9, 256, %s2108_s22, %s1023_s1, %s1643_s30, %s1643_s30, %s1644_s19  }
 0x36d PF: > { %s2199_s29 = sld [smem:[#allocation19_spill]]  ;;  %s1051_s23 = sand.u32 1, %s1604_s24  }
 0x36e   : > { %p2201_p1 = scmp.ge.s32.totalorder %s1616_s27, 2  ;;  %s1052_s17 = scalar_lea.sflag [#allocation4], %s1051_s23 }
 0x373   : > { %p2200_p0 = scmp.ne.s32.totalorder %s2199_s29, 0 }
 0x375   : > { %p1326_p2 = pnand %p2201_p1, %p2200_p0 }
 0x377   : > { %1599 = dma.done.wait (!%p1326_p2), %s1052_s17, 256  }
 0x378   : > { %1601 = vsyncadd (!%p1326_p2), %s1052_s17, 4294967040  ;;  %s2202_s8 = sld [smem:[#allocation20_spill]]  ;;  %p25_p3 = scmp.ge.s32.totalorder %s1817_s12, 4  }
 0x379   : > { %s2203_s24 = smov %s1608_s25  ;;  %s2204_s25 = smov %s1612_s26 }
 0x37a   : > { %s2206_s27 = smov %s1817_s12  ;;  %27 = sbr.rel (!%p25_p3) target bundleno = 14 (0xe), region = 119 }
 0x37e   : > { %s2205_s26 = smov %s2202_s8 }
 0x381   :  { %1057 = vsyncpa [#allocation3], 1 }
 0x382   :  { %1059 = vsyncpa [#allocation3 + $0x1], 1 }
 0x383   :  { %1060 = vsyncpa [#allocation8], 1 }
 0x384   :  { %1062 = vsyncpa [#allocation8 + $0x1], 1 }
 0x385   :  { %1063 = vsyncpa [#allocation11], 1 }
 0x386   :  { %1064 = vsyncpa [#allocation4], 1 }
 0x387   :  { %1066 = vsyncpa [#allocation4 + $0x1], 1 }
 0x388   :  { %1067 = vsyncpa [#allocation5], 1 }
 0x389   :  { %1069 = vsyncpa [#allocation5 + $0x1], 1 }

</bundles_post_ra>
